<compile_context>
chip_gen: v6e
topology: v6e:2x2x1
jax: 0.10.0
libtpu: 0.0.40
codegen_flags: <defaults>
</compile_context>

<pallas_src>
import jax
import jax.numpy as jnp
import numpy as np
from jax.experimental import pallas as pl
from jax.experimental.pallas import tpu as pltpu


def graph_conv_kernel(x_ref, a_ref, ab_ref, g_ref, w_ref, wb_ref, o_ref):
    # x_ref : (1, T*N, c_in)     float32   one batch element, time folded into rows
    # a_ref : (c_in, c_out)      float32   Align folded into a matrix (pad/id/1x1 conv)
    # ab_ref: (1, c_out)         float32   Align bias (zeros unless 1x1-conv branch)
    # g_ref : (T*N, T*N)         bfloat16  block-diagonal gso (T copies on the diagonal)
    # w_ref : (Ks, c_out, c_out) bfloat16  Chebyshev weights
    # wb_ref: (1, c_out)         float32   Chebyshev bias (zeros if bias=None)
    # o_ref : (1, T*N, c_out)    float32   x_gc_out in (T*N, c_out) layout
    Ks = w_ref.shape[0]

    x_raw = x_ref[0]                                             # (TN, c_in) f32

    # --- Align: x_gc_in = x @ A + b (exact for identity / zero-pad / 1x1 conv) ---
    x0 = jnp.dot(x_raw, a_ref[...],
                 preferred_element_type=jnp.float32) + ab_ref[...]   # (TN, c_out) f32
    x0_bf = x0.astype(jnp.bfloat16)

    g = g_ref[...]                                               # bf16 (TN, TN)

    # --- ChebGraphConv: recurrence + weight contraction, accumulate in f32 ---
    # k = 0 term: x_0 @ W_0
    acc = jnp.dot(x0_bf, w_ref[0],
                  preferred_element_type=jnp.float32)            # (TN, c_out) f32

    if Ks >= 2:
        # x_1 = gso x_0   (applied to every timestep at once via block-diag gso)
        x_km1 = jnp.dot(g, x0_bf,
                        preferred_element_type=jnp.float32)      # (TN, c_out) f32
        acc = acc + jnp.dot(x_km1.astype(jnp.bfloat16), w_ref[1],
                            preferred_element_type=jnp.float32)
        x_km2 = x0
        for k in range(2, Ks):                                   # static unroll
            x_k = 2.0 * jnp.dot(g, x_km1.astype(jnp.bfloat16),
                                preferred_element_type=jnp.float32) - x_km2
            acc = acc + jnp.dot(x_k.astype(jnp.bfloat16), w_ref[k],
                                preferred_element_type=jnp.float32)
            x_km2, x_km1 = x_km1, x_k

    # --- cheb bias + residual add of x_gc_in, single fused f32 epilogue ---
    o_ref[0] = (acc + wb_ref[...] + x0).astype(o_ref.dtype)


def graph_conv_layer_forward(x_nchw, params, *, c_out):
    """x_nchw: (B, c_in, T, N) like the PyTorch module. Returns (B, c_out, T, N)."""
    gso = params["gso"]
    w = params["weight"]                      # (Ks, c_out, c_out)
    b = params.get("bias")
    B, c_in, T, N = x_nchw.shape
    Ks = w.shape[0]
    TN = T * N

    # Align folded into a (c_in, c_out) matrix + bias.
    if c_in > c_out:
        # 1x1 conv: out[:, j] = sum_i W[j, i] * x[:, i] + bias[j]  ->  x @ W.T + bias
        A = jnp.transpose(params["align_w"].reshape(c_out, c_in), (1, 0)).astype(jnp.float32)
        ab = params["align_b"].reshape(1, c_out).astype(jnp.float32)
    else:
        # c_in < c_out -> zero-pad channels; c_in == c_out -> identity.
        A = jnp.eye(c_in, c_out, dtype=jnp.float32)
        ab = jnp.zeros((1, c_out), jnp.float32)

    wb = (jnp.zeros((1, c_out), jnp.float32) if b is None
          else b.reshape(1, c_out).astype(jnp.float32))

    # Block-diagonal gso over T timesteps: one (TN,TN)x(TN,c_out) matmul applies
    # the graph shift to every timestep at once (full 128-wide MXU contraction).
    bd_gso = jnp.kron(jnp.eye(T, dtype=jnp.float32), gso.astype(jnp.float32))

    # NCHW -> (B, T, N, c_in) -> (B, T*N, c_in): channels on lanes, rows = T*N.
    x_flat = jnp.transpose(x_nchw, (0, 2, 3, 1)).reshape(B, TN, c_in)
    x_flat = x_flat.astype(jnp.float32)

    out = pl.pallas_call(
        graph_conv_kernel,
        out_shape=jax.ShapeDtypeStruct((B, TN, c_out), jnp.float32),
        grid=(B,),
        in_specs=[
            pl.BlockSpec((1, TN, c_in), lambda bb: (bb, 0, 0)),
            pl.BlockSpec((c_in, c_out), lambda bb: (0, 0)),
            pl.BlockSpec((1, c_out), lambda bb: (0, 0)),
            pl.BlockSpec((TN, TN), lambda bb: (0, 0)),
            pl.BlockSpec((Ks, c_out, c_out), lambda bb: (0, 0, 0)),
            pl.BlockSpec((1, c_out), lambda bb: (0, 0)),
        ],
        out_specs=pl.BlockSpec((1, TN, c_out), lambda bb: (bb, 0, 0)),
        compiler_params=pltpu.CompilerParams(
            dimension_semantics=("parallel",)),
    )(x_flat, A, ab,
      bd_gso.astype(jnp.bfloat16), w.astype(jnp.bfloat16), wb)

    # (B, T*N, c_out) -> (B, T, N, c_out) -> NCHW (B, c_out, T, N)
    return jnp.transpose(out.reshape(B, T, N, c_out), (0, 3, 1, 2))


def ref_forward(x_nchw, gso, w, b, c_out):
    """Plain-JAX (f32, HIGHEST precision) reference of GraphConvLayer.forward."""
    B, c_in, T, N = x_nchw.shape
    Ks = w.shape[0]
    hp = jax.lax.Precision.HIGHEST

    # Align (c_in < c_out -> zero pad; c_in == c_out -> identity)
    if c_in < c_out:
        x_in = jnp.concatenate(
            [x_nchw, jnp.zeros((B, c_out - c_in, T, N), x_nchw.dtype)], axis=1)
    else:
        x_in = x_nchw

    x = jnp.transpose(x_in, (0, 2, 3, 1))                        # (B,T,N,c_out)
    x_list = [x]
    if Ks >= 2:
        x_list.append(jnp.einsum('hi,btic->bthc', gso, x, precision=hp))
        for k in range(2, Ks):
            x_list.append(
                jnp.einsum('hi,btic->bthc', 2.0 * gso, x_list[k - 1],
                           precision=hp) - x_list[k - 2])
    xs = jnp.stack(x_list, axis=2)                               # (B,T,Ks,N,c_out)
    gc = jnp.einsum('btkhi,kij->bthj', xs, w, precision=hp)
    if b is not None:
        gc = gc + b
    gc = jnp.transpose(gc, (0, 3, 1, 2))                         # (B,c_out,T,N)
    return gc + x_in


if __name__ == "__main__":
    # GraphConvLayer('cheb_graph_conv', c_in=64, c_out=128, Ks=3, gso, bias=True)
    B, c_in, T, N = 2, 64, 8, 16
    c_out, Ks = 128, 3

    key = jax.random.PRNGKey(0)
    kx, kg, kw, kb = jax.random.split(key, 4)

    x = jax.random.normal(kx, (B, c_in, T, N), jnp.float32)

    # Symmetric-normalized random graph shift operator (typical Cheb gso).
    adj = jax.random.uniform(kg, (N, N), jnp.float32)
    adj = 0.5 * (adj + adj.T)
    deg = jnp.sum(adj, axis=1)
    gso = adj / jnp.sqrt(deg[:, None] * deg[None, :])

    w = 0.1 * jax.random.normal(kw, (Ks, c_out, c_out), jnp.float32)
    b = 0.1 * jax.random.normal(kb, (c_out,), jnp.float32)
    params = {"gso": gso, "weight": w, "bias": b}

    fwd = jax.jit(graph_conv_layer_forward, static_argnames=("c_out",))
    out = jax.block_until_ready(fwd(x, params, c_out=c_out))
    ref = jax.block_until_ready(ref_forward(x, gso, w, b, c_out))

    assert out.shape == (B, c_out, T, N), out.shape
    np.testing.assert_allclose(np.asarray(out), np.asarray(ref),
                               rtol=2e-2, atol=2e-2)
    print("KERNEL_OK")
</pallas_src>

<mosaic_0001>
module attributes {stable_mosaic.version = 11 : i64} {
  func.func @graph_conv_kernel(%arg0: i32, %arg1: memref<1x128x64xf32, #tpu.memory_space<vmem>>, %arg2: memref<64x128xf32, #tpu.memory_space<vmem>>, %arg3: memref<1x128xf32, #tpu.memory_space<vmem>>, %arg4: memref<128x128xbf16, #tpu.memory_space<vmem>>, %arg5: memref<3x128x128xbf16, #tpu.memory_space<vmem>>, %arg6: memref<1x128xf32, #tpu.memory_space<vmem>>, %arg7: memref<1x128x128xf32, #tpu.memory_space<vmem>>) attributes {dimension_semantics = [#tpu.dimension_semantics<parallel>], iteration_bounds = array<i64: 2>, scalar_prefetch = 0 : i64, scratch_operands = 0 : i64, tpu.core_type = #tpu.core_type<tc>, window_params = [{transform_indices = @transform_0, window_bounds = array<i64: 1, 128, 64>}, {pipeline_mode = #tpu.pipeline_mode<synchronous>, transform_indices = @transform_1, window_bounds = array<i64: 64, 128>}, {pipeline_mode = #tpu.pipeline_mode<synchronous>, transform_indices = @transform_2, window_bounds = array<i64: 1, 128>}, {pipeline_mode = #tpu.pipeline_mode<synchronous>, transform_indices = @transform_3, window_bounds = array<i64: 128, 128>}, {pipeline_mode = #tpu.pipeline_mode<synchronous>, transform_indices = @transform_4, window_bounds = array<i64: 3, 128, 128>}, {pipeline_mode = #tpu.pipeline_mode<synchronous>, transform_indices = @transform_5, window_bounds = array<i64: 1, 128>}, {transform_indices = @transform_6, window_bounds = array<i64: 1, 128, 128>}]} {
    %c0 = arith.constant 0 : index
    %c0_0 = arith.constant 0 : index
    %c0_1 = arith.constant 0 : index
    %0 = vector.load %arg1[%c0, %c0_0, %c0_1] : memref<1x128x64xf32, #tpu.memory_space<vmem>>, vector<1x128x64xf32>
    %1 = vector.shape_cast %0 : vector<1x128x64xf32> to vector<128x64xf32>
    %c0_2 = arith.constant 0 : index
    %c0_3 = arith.constant 0 : index
    %2 = vector.load %arg2[%c0_2, %c0_3] : memref<64x128xf32, #tpu.memory_space<vmem>>, vector<64x128xf32>
    %cst = arith.constant dense<0.000000e+00> : vector<128x128xf32>
    %3 = tpu.matmul %1, %2, %cst {dimension_numbers = #tpu.dot_dimension_numbers<[1], [0], [0], [1], [0, 0, 1, 1], [], []>} : vector<128x64xf32>, vector<64x128xf32>, vector<128x128xf32> -> vector<128x128xf32>
    %c0_4 = arith.constant 0 : index
    %c0_5 = arith.constant 0 : index
    %4 = vector.load %arg3[%c0_4, %c0_5] : memref<1x128xf32, #tpu.memory_space<vmem>>, vector<1x128xf32>
    %5 = vector.broadcast %4 : vector<1x128xf32> to vector<128x128xf32>
    %6 = arith.addf %3, %5 : vector<128x128xf32>
    %7 = arith.truncf %6 : vector<128x128xf32> to vector<128x128xbf16>
    %c0_6 = arith.constant 0 : index
    %c0_7 = arith.constant 0 : index
    %8 = vector.load %arg4[%c0_6, %c0_7] : memref<128x128xbf16, #tpu.memory_space<vmem>>, vector<128x128xbf16>
    %c0_8 = arith.constant 0 : index
    %c0_9 = arith.constant 0 : index
    %c0_10 = arith.constant 0 : index
    %9 = vector.load %arg5[%c0_8, %c0_9, %c0_10] : memref<3x128x128xbf16, #tpu.memory_space<vmem>>, vector<1x128x128xbf16>
    %10 = vector.shape_cast %9 : vector<1x128x128xbf16> to vector<128x128xbf16>
    %cst_11 = arith.constant dense<0.000000e+00> : vector<128x128xf32>
    %11 = tpu.matmul %7, %10, %cst_11 {dimension_numbers = #tpu.dot_dimension_numbers<[1], [0], [0], [1], [0, 0, 1, 1], [], []>} : vector<128x128xbf16>, vector<128x128xbf16>, vector<128x128xf32> -> vector<128x128xf32>
    %cst_12 = arith.constant dense<0.000000e+00> : vector<128x128xf32>
    %12 = tpu.matmul %8, %7, %cst_12 {dimension_numbers = #tpu.dot_dimension_numbers<[1], [0], [0], [1], [0, 0, 1, 1], [], []>} : vector<128x128xbf16>, vector<128x128xbf16>, vector<128x128xf32> -> vector<128x128xf32>
    %13 = arith.truncf %12 : vector<128x128xf32> to vector<128x128xbf16>
    %c1 = arith.constant 1 : index
    %c0_13 = arith.constant 0 : index
    %c0_14 = arith.constant 0 : index
    %14 = vector.load %arg5[%c1, %c0_13, %c0_14] : memref<3x128x128xbf16, #tpu.memory_space<vmem>>, vector<1x128x128xbf16>
    %15 = vector.shape_cast %14 : vector<1x128x128xbf16> to vector<128x128xbf16>
    %cst_15 = arith.constant dense<0.000000e+00> : vector<128x128xf32>
    %16 = tpu.matmul %13, %15, %cst_15 {dimension_numbers = #tpu.dot_dimension_numbers<[1], [0], [0], [1], [0, 0, 1, 1], [], []>} : vector<128x128xbf16>, vector<128x128xbf16>, vector<128x128xf32> -> vector<128x128xf32>
    %17 = arith.addf %11, %16 : vector<128x128xf32>
    %18 = arith.truncf %12 : vector<128x128xf32> to vector<128x128xbf16>
    %cst_16 = arith.constant dense<0.000000e+00> : vector<128x128xf32>
    %19 = tpu.matmul %8, %18, %cst_16 {dimension_numbers = #tpu.dot_dimension_numbers<[1], [0], [0], [1], [0, 0, 1, 1], [], []>} : vector<128x128xbf16>, vector<128x128xbf16>, vector<128x128xf32> -> vector<128x128xf32>
    %cst_17 = arith.constant 2.000000e+00 : f32
    %20 = vector.broadcast %cst_17 : f32 to vector<128x128xf32>
    %21 = arith.mulf %20, %19 : vector<128x128xf32>
    %22 = arith.subf %21, %6 : vector<128x128xf32>
    %23 = arith.truncf %22 : vector<128x128xf32> to vector<128x128xbf16>
    %c2 = arith.constant 2 : index
    %c0_18 = arith.constant 0 : index
    %c0_19 = arith.constant 0 : index
    %24 = vector.load %arg5[%c2, %c0_18, %c0_19] : memref<3x128x128xbf16, #tpu.memory_space<vmem>>, vector<1x128x128xbf16>
    %25 = vector.shape_cast %24 : vector<1x128x128xbf16> to vector<128x128xbf16>
    %cst_20 = arith.constant dense<0.000000e+00> : vector<128x128xf32>
    %26 = tpu.matmul %23, %25, %cst_20 {dimension_numbers = #tpu.dot_dimension_numbers<[1], [0], [0], [1], [0, 0, 1, 1], [], []>} : vector<128x128xbf16>, vector<128x128xbf16>, vector<128x128xf32> -> vector<128x128xf32>
    %27 = arith.addf %17, %26 : vector<128x128xf32>
    %c0_21 = arith.constant 0 : index
    %c0_22 = arith.constant 0 : index
    %28 = vector.load %arg6[%c0_21, %c0_22] : memref<1x128xf32, #tpu.memory_space<vmem>>, vector<1x128xf32>
    %29 = vector.broadcast %28 : vector<1x128xf32> to vector<128x128xf32>
    %30 = arith.addf %27, %29 : vector<128x128xf32>
    %31 = arith.addf %30, %6 : vector<128x128xf32>
    %c0_23 = arith.constant 0 : index
    %c0_24 = arith.constant 0 : index
    %c0_25 = arith.constant 0 : index
    %32 = vector.load %arg7[%c0_23, %c0_24, %c0_25] : memref<1x128x128xf32, #tpu.memory_space<vmem>>, vector<1x128x128xf32>
    %33 = vector.shape_cast %32 : vector<1x128x128xf32> to vector<128x128xf32>
    %34 = vector.shape_cast %31 : vector<128x128xf32> to vector<1x128x128xf32>
    tpu.vector_store %arg7[%c0_23, %c0_24, %c0_25], %34 {strides = array<i32>} : memref<1x128x128xf32, #tpu.memory_space<vmem>>, vector<1x128x128xf32>,
    return
  }
  func.func @transform_0(%arg0: i32) -> (i32, i32, i32) {
    %c0_i32 = arith.constant 0 : i32
    %c0_i32_0 = arith.constant 0 : i32
    %c0_i32_1 = arith.constant 0 : i32
    return %arg0, %c0_i32, %c0_i32_0 : i32, i32, i32
  }
  func.func @transform_1(%arg0: i32) -> (i32, i32) {
    %c0_i32 = arith.constant 0 : i32
    %c0_i32_0 = arith.constant 0 : i32
    %c0_i32_1 = arith.constant 0 : i32
    return %c0_i32, %c0_i32_0 : i32, i32
  }
  func.func @transform_2(%arg0: i32) -> (i32, i32) {
    %c0_i32 = arith.constant 0 : i32
    %c0_i32_0 = arith.constant 0 : i32
    %c0_i32_1 = arith.constant 0 : i32
    return %c0_i32, %c0_i32_0 : i32, i32
  }
  func.func @transform_3(%arg0: i32) -> (i32, i32) {
    %c0_i32 = arith.constant 0 : i32
    %c0_i32_0 = arith.constant 0 : i32
    %c0_i32_1 = arith.constant 0 : i32
    return %c0_i32, %c0_i32_0 : i32, i32
  }
  func.func @transform_4(%arg0: i32) -> (i32, i32, i32) {
    %c0_i32 = arith.constant 0 : i32
    %c0_i32_0 = arith.constant 0 : i32
    %c0_i32_1 = arith.constant 0 : i32
    %c0_i32_2 = arith.constant 0 : i32
    return %c0_i32, %c0_i32_0, %c0_i32_1 : i32, i32, i32
  }
  func.func @transform_5(%arg0: i32) -> (i32, i32) {
    %c0_i32 = arith.constant 0 : i32
    %c0_i32_0 = arith.constant 0 : i32
    %c0_i32_1 = arith.constant 0 : i32
    return %c0_i32, %c0_i32_0 : i32, i32
  }
  func.func @transform_6(%arg0: i32) -> (i32, i32, i32) {
    %c0_i32 = arith.constant 0 : i32
    %c0_i32_0 = arith.constant 0 : i32
    %c0_i32_1 = arith.constant 0 : i32
    return %arg0, %c0_i32, %c0_i32_0 : i32, i32, i32
  }
}

</mosaic_0001>

<bundles_post_ra>
// kernel: graph_conv_layer_forward.1
= control target key start
LH: loop header
LB: loop body
LE: loop exit
PB: predicated region body
PF: predicated region fallthrough
CT: control target
= control target key end

     0   :  { %11 = vsyncpa [#allocation3], 0  ;;  %s2512_s0 = inlined_call_operand.vmem [shape: f32[2,128,64], index: 0, kind: input, shape index: {}]   ;;  %s2513_s1 = inlined_call_operand.vmem [shape: f32[64,128], index: 1, kind: input, shape index: {}]   ;;  %s2514_s2 = inlined_call_operand.vmem [shape: f32[1,128], index: 2, kind: input, shape index: {}]   ;;  %s2515_s3 = inlined_call_operand.vmem [shape: bf16[128,128], index: 3, kind: input, shape index: {}]   ;;  %s2516_s4 = inlined_call_operand.vmem [shape: bf16[3,128,128], index: 4, kind: input, shape index: {}]   ;;  %s2517_s5 = inlined_call_operand.vmem [shape: f32[1,128], index: 5, kind: input, shape index: {}]   ;;  %s2518_s6 = inlined_call_operand.hbm [shape: f32[2,128,128], index: 6, kind: output, shape index: {}]  }
   0x1   :  { %13 = vsyncpa [#allocation3 + $0x1], 0  ;;  %s2011_s21 = smov 0   ;;  %s2013_s22 = smov 0  }
   0x2   :  { %s2015_s23 = smov 0   ;;  %s2017_s24 = smov 0  }
   0x3 LB: > { %s2032_s25 = sadd.s32 4294967295, %s1971_s24   ;;  %s1422_s26 = sadd.s32 4294967294, %s1971_s24   ;;  %s1971_s24 = sphi %s2017_s24, %s2524_s24   ;;  %s1967_s23 = sphi %s2015_s23, %s2523_s23   ;;  %s1963_s22 = sphi %s2013_s22, %s2522_s22   ;;  %s1959_s21 = sphi %s2011_s21, %s2521_s21  }
   0x4   : > { %s2036_s27 = sadd.s32 1, %s1971_s24   ;;  %s157_s28 = sadd.s32 1, %s1967_s23 }
   0x5   : > { %s154_s29 = ssub.s32 %s1971_s24, %s2036_s27  ;;  %p167_p0 = scmp.ne.s32.totalorder %s1967_s23, %s1963_s22 }
   0x6   : > { %p155_p1 = scmp.eq.s32.totalorder %s154_s29, 0  ;;  %p168_p2 = scmp.eq.s32.totalorder %s2032_s25, 1 }
   0x7   : > { %p173_p3 = scmp.ne.s32.totalorder %s1963_s22, %s1959_s21  ;;  %p174_p4 = scmp.eq.s32.totalorder %s1422_s26, 1 }
   0x8   : > { %s2047_s30 = scalar_select %p155_p1, %s1967_s23, %s157_s28  }
   0x9   : > { %p2049_p5 = por %p168_p2, %p167_p0  ;;  %p2053_p6 = por %p174_p4, %p173_p3 }
   0xa   : > { %p1425_p7 = scmp.ge.s32.totalorder %s1971_s24, 1  ;;  %p215_p8 = scmp.lt.s32.totalorder %s1971_s24, 3 }
   0xc   : > { %p216_p9 = pnand %p1425_p7, %p215_p8 }
   0xd   : > { %p245_p10 = scmp.lt.s32.totalorder (!%p216_p9), %s2032_s25, 1  ;;  %s1517_s11 = sshll.u32 (!%p216_p9), %s2032_s25, 11 }
   0xe   : > { %219 = sbr.rel (%p216_p9) target bundleno = 999 (0x3e7), region = 44  ;;  %s1973_s17 = smov (!%p216_p9), [#allocation2]  }
  0x13   : > { %v274_v0 = vld [vmem:[%s2513_s1 + $0x38] sm:$0xff]  ;;  %v273_v1 = vld [vmem:[%s2513_s1 + $0x30] sm:$0xff]  ;;  %v272_v2 = vld [vmem:[%s2513_s1 + $0x28] sm:$0xff]  ;;  %s246_s15 = scalar_select %p245_p10, %s2032_s25, 1  ;;  %vm282_vm0 = vcmask 523264  }
  0x14   : > { %1622 = vmatprep.subr.mxu0 %v274_v0  ;;  %v271_v3 = vld [vmem:[%s2513_s1 + $0x20] sm:$0xff]  ;;  %v270_v4 = vld [vmem:[%s2513_s1 + $0x18] sm:$0xff]  ;;  %v269_v6 = vld [vmem:[%s2513_s1 + $0x10] sm:$0xff] }
  0x15   : > { %1623 = vmatpush3.msra.mxu0 %v274_v0  ;;  %s1516_s18 = sshll.u32 %s246_s15, 7  ;;  %v268_v7 = vld [vmem:[%s2513_s1 + $0x8] sm:$0xff]  ;;  %v267_v8 = vld [vmem:[%s2513_s1] sm:$0xff]  ;;  %v1895_v25 = vld [vmem:[%s2516_s4 + $0x78] sm:$0xff]   ;;  %s2463_s15 = scalar_lea.hbm %s2518_s6, %s1517_s11 }
  0x16   : > { %1624 = vmatprep.subr.mxu0 %v273_v1  ;;  %s2076_s26 = scalar_lea.vmem %s2512_s0, %s1516_s18  ;;  %v2125_v24 = vld [vmem:[%s2515_s3] sm:$0xff]   ;;  %v1896_v26 = vld [vmem:[%s2516_s4 + $0x70] sm:$0xff]   ;;  %v1897_v27 = vld [vmem:[%s2516_s4 + $0x68] sm:$0xff]   ;;  %s1915_s18 = sshll.u32 %s1973_s17, 4  ;;  %s1916_s18 = int_to_ptr.vmem [resolvable:$false] %s1915_s18 }
  0x17   : > { %1625 = vmatpush3.msra.mxu0 %v273_v1  ;;  %v251_v5 = vld [vmem:[%s2076_s26] sm:$0xff]  ;;  %v252_v9 = vld [vmem:[%s2076_s26 + $0x8] sm:$0xff]  ;;  %v253_v10 = vld [vmem:[%s2076_s26 + $0x10] sm:$0xff]  ;;  %1678 = vmatprep.mubr.bf16.mxu1 %v2125_v24  ;;  %s1917_s19 = scalar_lea.vmem %s1916_s18, 4096 }
  0x18   : > { %1626 = vmatprep.subr.mxu0 %v272_v2  ;;  %1638 = vmatprep.mubr.msk.f32.mxu0 %vm282_vm0, %v251_v5  ;;  %v254_v11 = vld [vmem:[%s2076_s26 + $0x18] sm:$0xff]  ;;  %v255_v12 = vld [vmem:[%s2076_s26 + $0x20] sm:$0xff]  ;;  %v256_v13 = vld [vmem:[%s2076_s26 + $0x28] sm:$0xff] }
  0x19   : > { %1627 = vmatpush3.msra.mxu0 %v272_v2  ;;  %v257_v14 = vld [vmem:[%s2076_s26 + $0x30] sm:$0xff]  ;;  %v258_v15 = vld [vmem:[%s2076_s26 + $0x38] sm:$0xff]  ;;  %v259_v16 = vld [vmem:[%s2076_s26 + $0x40] sm:$0xff] }
  0x1a   : > { %1628 = vmatprep.subr.mxu0 %v271_v3  ;;  %v260_v17 = vld [vmem:[%s2076_s26 + $0x48] sm:$0xff]  ;;  %v261_v18 = vld [vmem:[%s2076_s26 + $0x50] sm:$0xff]  ;;  %v262_v19 = vld [vmem:[%s2076_s26 + $0x58] sm:$0xff] }
  0x1b   : > { %1629 = vmatpush3.msra.mxu0 %v271_v3  ;;  %v263_v20 = vld [vmem:[%s2076_s26 + $0x60] sm:$0xff]  ;;  %v264_v21 = vld [vmem:[%s2076_s26 + $0x68] sm:$0xff]  ;;  %v265_v22 = vld [vmem:[%s2076_s26 + $0x70] sm:$0xff] }
  0x1c   : > { %1630 = vmatprep.subr.mxu0 %v270_v4  ;;  %v266_v23 = vld [vmem:[%s2076_s26 + $0x78] sm:$0xff]  ;;  %v1898_v30 = vld [vmem:[%s2516_s4 + $0x60] sm:$0xff]   ;;  %v1900_v36 = vld [vmem:[%s2516_s4 + $0x50] sm:$0xff]   ;;  %s242_s26 = sand.u32 1, %s1963_s22  }
  0x1d   : > { %1631 = vmatpush3.msra.mxu0 %v270_v4  ;;  %v1899_v33 = vld [vmem:[%s2516_s4 + $0x58] sm:$0xff]   ;;  %v1429_v46 = vld [vmem:[%s2514_s2] ss:$0 sm:$0xff]  ;;  %s1426_s9 = sshll.u32 %s242_s26, 7  ;;  %s2472_s25 = scalar_lea.sflag [#allocation3], %s242_s26 }
  0x1e   : > { %1632 = vmatprep.subr.mxu0 %v269_v6  ;;  %s2398_s10 = scalar_lea.vmem [#allocation2], %s1426_s9 }
  0x1f   : > { %1633 = vmatpush3.msra.mxu0 %v269_v6  ;;  %s1360_s12 = sshll.u32 %s2398_s10, 4  ;;  %s2465_s12 = int_to_ptr.vmem [resolvable:$true] %s1360_s12 }
  0x20   : > { %1634 = vmatprep.subr.mxu0 %v268_v7  ;;  %s1911_s16 = scalar_lea.vmem %s2465_s12, 2048  ;;  %p1918_p0 = scmp.lt.s32.totalorder %s2465_s12, %s1916_s18 }
  0x21   : > { %1635 = vmatpush3.msra.mxu0 %v268_v7  ;;  %p1912_p11 = scmp.ne.s32.totalorder %s2465_s12, %s1911_s16  ;;  %p1919_p1 = scmp.lt.s32.totalorder %s1917_s19, %s1911_s16 }
  0x22   : > { %1636 = vmatprep.subr.mxu0 %v267_v8 }
  0x23   : > { %1637 = vmatpush3.msra.mxu0 %v267_v8  ;;  %v1881_v8 = vld [vmem:[%s2516_s4 + $0x38] sm:$0xff]   ;;  %p1913_p12 = pnand %p1912_p11, %p2049_p5  ;;  %p1920_p2 = por %p1919_p1, %p1918_p0 }
  0x24   : > { %1639 = vmatmul.mubr.msk.f32.vlgmr.msra.gmra.mxu0 %vm282_vm0, %v252_v9  ;;  %1694 = vmatprep.subr.bf16.mxu0 %v1895_v25  ;;  %v2222_v9 = vld [vmem:[%s2515_s3 + $0x8] sm:$0xff]  }
  0x25   : > { %1641 = vmatprep.mubr.msk.f32.mxu0 %vm282_vm0, %v253_v10  ;;  %1695 = vmatpush3.bf16.msra.mxu0 %v1895_v25  ;;  %v2227_v10 = vld [vmem:[%s2515_s3 + $0x10] sm:$0xff]   ;;  %v1902_v25 = vld [vmem:[%s2516_s4 + $0x40] sm:$0xff]   ;;  %p1914_p13 = pneg %p1913_p12 }
  0x26   : > { %1696 = vmatprep.subr.bf16.mxu0 %v1896_v26 }
  0x27   : > { %p1921_p3 = pnand %p1920_p2, %p1914_p13 }
  0x28   : > { %1642 = vmatmul.mubr.msk.f32.gmra.mxu0 %vm282_vm0, %v254_v11  ;;  %v1882_v11 = vld [vmem:[%s2516_s4 + $0x30] sm:$0xff]  }
  0x29   : > { %1644 = vmatprep.mubr.msk.f32.mxu0 %vm282_vm0, %v255_v12  ;;  %1697 = vmatpush3.bf16.msra.mxu0 %v1896_v26  ;;  %v1885_v12 = vld [vmem:[%s2516_s4 + $0x28] sm:$0xff]  }
  0x2a   : > { %1698 = vmatprep.subr.bf16.mxu0 %v1897_v27 }
  0x2c   : > { %1645 = vmatmul.mubr.msk.f32.gmra.mxu0 %vm282_vm0, %v256_v13  ;;  %v2240_v13 = vld [vmem:[%s2515_s3 + $0x18] sm:$0xff]  }
  0x2d   : > { %1647 = vmatprep.mubr.msk.f32.mxu0 %vm282_vm0, %v257_v14  ;;  %1699 = vmatpush3.bf16.msra.mxu0 %v1897_v27  ;;  %v2245_v14 = vld [vmem:[%s2515_s3 + $0x20] sm:$0xff]  }
  0x2e   : > { %1700 = vmatprep.subr.bf16.mxu0 %v1898_v30 }
  0x30   : > { %1648 = vmatmul.mubr.msk.f32.gmra.mxu0 %vm282_vm0, %v258_v15  ;;  %v1886_v15 = vld [vmem:[%s2516_s4 + $0x20] sm:$0xff]  }
  0x31   : > { %1650 = vmatprep.mubr.msk.f32.mxu0 %vm282_vm0, %v259_v16  ;;  %1701 = vmatpush3.bf16.msra.mxu0 %v1898_v30  ;;  %v1889_v16 = vld [vmem:[%s2516_s4 + $0x18] sm:$0xff]  }
  0x32   : > { %1702 = vmatprep.subr.bf16.mxu0 %v1899_v33 }
  0x34   : > { %1651 = vmatmul.mubr.msk.f32.gmra.mxu0 %vm282_vm0, %v260_v17  ;;  %v2258_v17 = vld [vmem:[%s2515_s3 + $0x28] sm:$0xff]  }
  0x35   : > { %1653 = vmatprep.mubr.msk.f32.mxu0 %vm282_vm0, %v261_v18  ;;  %1703 = vmatpush3.bf16.msra.mxu0 %v1899_v33  ;;  %v2263_v18 = vld [vmem:[%s2515_s3 + $0x30] sm:$0xff]  }
  0x36   : > { %1704 = vmatprep.subr.bf16.mxu0 %v1900_v36 }
  0x38   : > { %1654 = vmatmul.mubr.msk.f32.gmra.mxu0 %vm282_vm0, %v262_v19  ;;  %v1890_v19 = vld [vmem:[%s2516_s4 + $0x10] sm:$0xff]  }
  0x39   : > { %1656 = vmatprep.mubr.msk.f32.mxu0 %vm282_vm0, %v263_v20  ;;  %1705 = vmatpush3.bf16.msra.mxu0 %v1900_v36  ;;  %v1893_v20 = vld [vmem:[%s2516_s4 + $0x8] sm:$0xff]  }
  0x3c   : > { %1657 = vmatmul.mubr.msk.f32.gmra.mxu0 %vm282_vm0, %v264_v21  ;;  %v2276_v21 = vld [vmem:[%s2515_s3 + $0x38] sm:$0xff]  }
  0x3d   : > { %1659 = vmatprep.mubr.msk.f32.mxu0 %vm282_vm0, %v265_v22  ;;  %v1894_v22 = vld [vmem:[%s2516_s4] sm:$0xff]  }
  0x40   : > { %1660 = vmatmul.mubr.msk.f32.gmra.mxu0 %vm282_vm0, %v266_v23  ;;  %v1901_v23 = vld [vmem:[%s2516_s4 + $0x48] sm:$0xff]  }
  0x41   : > { %1706 = vmatprep.subr.bf16.mxu0 %v1901_v23 }
  0x42   : > { %1707 = vmatpush3.bf16.msra.mxu0 %v1901_v23 }
  0x43   : > { %1708 = vmatprep.subr.bf16.mxu0 %v1902_v25 }
  0x46   : > { %1709 = vmatpush3.bf16.msra.mxu0 %v1902_v25 }
  0xe4   : > { %v2137_v28 = vpop.f32.mrf.mxu0 }
  0xe5   : > { %v2212_v6 = vadd.f32 %v2137_v28, %v1429_v46 }
  0xe6   : > { %v397_v29 = vpop.f32.mrf.mxu0 }
  0xe7   : > { %v2207_v4 = vadd.f32 %v1429_v46, %v397_v29 }
  0xe8   : > { %v1643_v31 = vpop.f32.mrf.mxu0 }
  0xe9   : > { %v2205_v3 = vadd.f32 %v1643_v31, %v1429_v46  ;;  %v476_v7 = vpack.c.bf16 %v2212_v6, %v2207_v4 }
  0xea   : > { %v407_v32 = vpop.f32.mrf.mxu0 }
  0xeb   : > { %v2201_v1 = vadd.f32 %v1429_v46, %v407_v32 }
  0xec   : > { %v1646_v34 = vpop.f32.mrf.mxu0 }
  0xed   : > { %v2199_v0 = vadd.f32 %v1646_v34, %v1429_v46  ;;  %v477_v5 = vpack.c.bf16 %v2205_v3, %v2201_v1 }
  0xee   : > { %v417_v35 = vpop.f32.mrf.mxu0 }
  0xef   : > { %v2194_v62 = vadd.f32 %v1429_v46, %v417_v35 }
  0xf0   : > { %v1649_v37 = vpop.f32.mrf.mxu0 }
  0xf1   : > { %v2191_v61 = vadd.f32 %v1649_v37, %v1429_v46  ;;  %v478_v2 = vpack.c.bf16 %v2199_v0, %v2194_v62 }
  0xf2   : > { %v427_v38 = vpop.f32.mrf.mxu0 }
  0xf3   : > { %v2184_v59 = vadd.f32 %v1429_v46, %v427_v38 }
  0xf4   : > { %v1652_v39 = vpop.f32.mrf.mxu0 }
  0xf5   : > { %v2181_v58 = vadd.f32 %v1652_v39, %v1429_v46  ;;  %v479_v63 = vpack.c.bf16 %v2191_v61, %v2184_v59 }
  0xf6   : > { %v437_v40 = vpop.f32.mrf.mxu0 }
  0xf7   : > { %v2174_v56 = vadd.f32 %v1429_v46, %v437_v40 }
  0xf8   : > { %v1655_v41 = vpop.f32.mrf.mxu0 }
  0xf9   : > { %v2171_v55 = vadd.f32 %v1655_v41, %v1429_v46  ;;  %v2188_v60 = vpack.c.bf16 %v2181_v58, %v2174_v56 }
  0xfa   : > { %v447_v42 = vpop.f32.mrf.mxu0 }
  0xfb   : > { %v2163_v53 = vadd.f32 %v1429_v46, %v447_v42 }
  0xfc   : > { %v1658_v43 = vpop.f32.mrf.mxu0 }
  0xfd   : > { %v2157_v51 = vadd.f32 %v1658_v43, %v1429_v46  ;;  %v2178_v57 = vpack.c.bf16 %v2171_v55, %v2163_v53 }
  0xfe   : > { %v457_v44 = vpop.f32.mrf.mxu0 }
  0xff   : > { %v2151_v48 = vadd.f32 %v1429_v46, %v457_v44 }
 0x100   : > { %v1661_v45 = vpop.f32.mrf.mxu0 }
 0x101   : > { %v2153_v49 = vadd.f32 %v1661_v45, %v1429_v46  ;;  %v2168_v54 = vpack.c.bf16 %v2157_v51, %v2151_v48 }
 0x102   : > { %v467_v47 = vpop.f32.mrf.mxu0 }
 0x103   : > { %v2155_v50 = vadd.f32 %v1429_v46, %v467_v47 }
 0x105   : > { %v2161_v52 = vpack.c.bf16 %v2153_v49, %v2155_v50 }
 0x107   : > { %1662 = vmatprep.subr.bf16.mxu1 %v2161_v52 }
 0x108   : > { %1663 = vmatpush3.bf16.msra.mxu1 %v2161_v52 }
 0x109   : > { %1664 = vmatprep.subr.bf16.mxu1 %v2168_v54 }
 0x10c   : > { %1665 = vmatpush3.bf16.msra.mxu1 %v2168_v54 }
 0x10d   : > { %1666 = vmatprep.subr.bf16.mxu1 %v2178_v57 }
 0x110   : > { %1667 = vmatpush3.bf16.msra.mxu1 %v2178_v57 }
 0x111   : > { %1668 = vmatprep.subr.bf16.mxu1 %v2188_v60 }
 0x114   : > { %1669 = vmatpush3.bf16.msra.mxu1 %v2188_v60 }
 0x115   : > { %1670 = vmatprep.subr.bf16.mxu1 %v479_v63 }
 0x118   : > { %1671 = vmatpush3.bf16.msra.mxu1 %v479_v63 }
 0x119   : > { %1672 = vmatprep.subr.bf16.mxu1 %v478_v2 }
 0x11c   : > { %1673 = vmatpush3.bf16.msra.mxu1 %v478_v2 }
 0x11d   : > { %1674 = vmatprep.subr.bf16.mxu1 %v477_v5 }
 0x120   : > { %1675 = vmatpush3.bf16.msra.mxu1 %v477_v5 }
 0x121   : > { %1676 = vmatprep.subr.bf16.mxu1 %v476_v7 }
 0x124   : > { %1677 = vmatpush3.bf16.msra.mxu1 %v476_v7 }
 0x125   : > { %1726 = vmatprep.subr.bf16.mxu1 %v1881_v8 }
 0x127   : > { %1679 = vmatmul.mubr.bf16.vlgmr.msra.gmra.mxu1 %v2222_v9 }
 0x128   : > { %1727 = vmatpush3.bf16.msra.mxu1 %v1881_v8  ;;  %1682 = vmatprep.mubr.bf16.mxu1 %v2227_v10  ;;  %v1910_v8 = vld [vmem:[%s2516_s4 + $0x80] sm:$0xff]  }
 0x129   : > { %1728 = vmatprep.subr.bf16.mxu1 %v1882_v11 }
 0x12c   : > { %1729 = vmatpush3.bf16.msra.mxu1 %v1882_v11 }
 0x12d   : > { %1730 = vmatprep.subr.bf16.mxu1 %v1885_v12 }
 0x12f   : > { %1683 = vmatmul.mubr.bf16.gmra.mxu1 %v2240_v13 }
 0x130   : > { %1731 = vmatpush3.bf16.msra.mxu1 %v1885_v12  ;;  %1686 = vmatprep.mubr.bf16.mxu1 %v2245_v14 }
 0x131   : > { %1732 = vmatprep.subr.bf16.mxu1 %v1886_v15 }
 0x134   : > { %1733 = vmatpush3.bf16.msra.mxu1 %v1886_v15 }
 0x135   : > { %1734 = vmatprep.subr.bf16.mxu1 %v1889_v16 }
 0x137   : > { %1687 = vmatmul.mubr.bf16.gmra.mxu1 %v2258_v17 }
 0x138   : > { %1735 = vmatpush3.bf16.msra.mxu1 %v1889_v16  ;;  %1690 = vmatprep.mubr.bf16.mxu1 %v2263_v18 }
 0x139   : > { %1736 = vmatprep.subr.bf16.mxu1 %v1890_v19 }
 0x13c   : > { %1737 = vmatpush3.bf16.msra.mxu1 %v1890_v19 }
 0x13d   : > { %1738 = vmatprep.subr.bf16.mxu1 %v1893_v20 }
 0x13f   : > { %1691 = vmatmul.mubr.bf16.gmra.mxu1 %v2276_v21 }
 0x140   : > { %1739 = vmatpush3.bf16.msra.mxu1 %v1893_v20  ;;  %1742 = vmatprep.mubr.bf16.mxu1 %v476_v7  ;;  %v1909_v7 = vld [vmem:[%s2516_s4 + $0x88] sm:$0xff]  }
 0x141   : > { %1740 = vmatprep.subr.bf16.mxu1 %v1894_v22 }
 0x144   : > { %1741 = vmatpush3.bf16.msra.mxu1 %v1894_v22 }
 0x147   : > { %1743 = vmatmul.mubr.bf16.vlgmr.msra.gmra.mxu1 %v477_v5  ;;  %v1908_v5 = vld [vmem:[%s2516_s4 + $0x90] sm:$0xff]  }
 0x148   : > { %1746 = vmatprep.mubr.bf16.mxu1 %v478_v2  ;;  %v1907_v2 = vld [vmem:[%s2516_s4 + $0x98] sm:$0xff]  }
 0x14f   : > { %1747 = vmatmul.mubr.bf16.gmra.mxu1 %v479_v63  ;;  %v1906_v63 = vld [vmem:[%s2516_s4 + $0xa0] sm:$0xff]  }
 0x150   : > { %1750 = vmatprep.mubr.bf16.mxu1 %v2188_v60  ;;  %v1905_v60 = vld [vmem:[%s2516_s4 + $0xa8] sm:$0xff]  }
 0x157   : > { %1751 = vmatmul.mubr.bf16.gmra.mxu1 %v2178_v57  ;;  %v1904_v57 = vld [vmem:[%s2516_s4 + $0xb0] sm:$0xff]  }
 0x158   : > { %1754 = vmatprep.mubr.bf16.mxu1 %v2168_v54 }
 0x15f   : > { %1755 = vmatmul.mubr.bf16.gmra.mxu1 %v2161_v52 }
 0x1e7   : > { %v1680_v26 = vpop.f32.mrf.mxu1 }
 0x1e9   : > { %v598_v27 = vpop.f32.mrf.mxu1 }
 0x1eb   : > { %v1681_v28 = vpop.f32.mrf.mxu1 }
 0x1ec   : > { %v662_v31 = vpack.c.bf16 %v1681_v28, %v1680_v26 }
 0x1ed   : > { %v601_v29 = vpop.f32.mrf.mxu1 }
 0x1ee   : > { %v661_v30 = vpack.c.bf16 %v601_v29, %v598_v27 }
 0x1ef   : > { %v1684_v32 = vpop.f32.mrf.mxu1 }
 0x1f0   : > { %1710 = vmatprep.mubr.bf16.mxu0 %v661_v30 }
 0x1f1   : > { %v614_v33 = vpop.f32.mrf.mxu1  ;;  %1711 = vmatmul.mubr.bf16.vlgmr.msra.gmra.mxu0 %v662_v31 }
 0x1f3   : > { %v1685_v34 = vpop.f32.mrf.mxu1 }
 0x1f4   : > { %v664_v37 = vpack.c.bf16 %v1685_v34, %v1684_v32 }
 0x1f5   : > { %v617_v35 = vpop.f32.mrf.mxu1 }
 0x1f6   : > { %v663_v36 = vpack.c.bf16 %v617_v35, %v614_v33 }
 0x1f7   : > { %v1688_v38 = vpop.f32.mrf.mxu1 }
 0x1f8   : > { %1714 = vmatprep.mubr.bf16.mxu0 %v663_v36 }
 0x1f9   : > { %v630_v39 = vpop.f32.mrf.mxu1  ;;  %1715 = vmatmul.mubr.bf16.gmra.mxu0 %v664_v37 }
 0x1fb   : > { %v1689_v40 = vpop.f32.mrf.mxu1 }
 0x1fc   : > { %v666_v43 = vpack.c.bf16 %v1689_v40, %v1688_v38 }
 0x1fd   : > { %v633_v41 = vpop.f32.mrf.mxu1 }
 0x1fe   : > { %v665_v42 = vpack.c.bf16 %v633_v41, %v630_v39 }
 0x1ff   : > { %v1692_v44 = vpop.f32.mrf.mxu1 }
 0x200   : > { %1718 = vmatprep.mubr.bf16.mxu0 %v665_v42 }
 0x201   : > { %v646_v45 = vpop.f32.mrf.mxu1  ;;  %1719 = vmatmul.mubr.bf16.gmra.mxu0 %v666_v43 }
 0x203   : > { %v1693_v46 = vpop.f32.mrf.mxu1 }
 0x204   : > { %v668_v47 = vpack.c.bf16 %v1693_v46, %v1692_v44 }
 0x205   : > { %v649_v52 = vpop.f32.mrf.mxu1 }
 0x206   : > { %v667_v54 = vpack.c.bf16 %v649_v52, %v646_v45  ;;  %1758 = vmatprep.subr.bf16.mxu0 %v668_v47 }
 0x207   : > { %1759 = vmatpush3.bf16.msra.mxu0 %v668_v47 }
 0x208   : > { %1722 = vmatprep.mubr.bf16.mxu0 %v667_v54  ;;  %1760 = vmatprep.subr.bf16.mxu0 %v667_v54 }
 0x209   : > { %1723 = vmatmul.mubr.bf16.gmra.mxu0 %v668_v47 }
 0x20a   : > { %1774 = vmatprep.mubr.bf16.mxu0 %v2125_v24  ;;  %v1903_v24 = vld [vmem:[%s2516_s4 + $0xb8] sm:$0xff]  }
 0x20b   : > { %1761 = vmatpush3.bf16.msra.mxu0 %v667_v54  ;;  %1822 = vmatprep.subr.bf16.mxu1 %v1903_v24 }
 0x20c   : > { %1762 = vmatprep.subr.bf16.mxu0 %v666_v43  ;;  %1830 = vmatpush3.bf16.msra.mxu1 %v1903_v24 }
 0x20d   : > { %1823 = vmatprep.subr.bf16.mxu1 %v1904_v57 }
 0x20f   : > { %1763 = vmatpush3.bf16.msra.mxu0 %v666_v43 }
 0x210   : > { %1764 = vmatprep.subr.bf16.mxu0 %v665_v42  ;;  %1831 = vmatpush3.bf16.msra.mxu1 %v1904_v57 }
 0x211   : > { %1824 = vmatprep.subr.bf16.mxu1 %v1905_v60 }
 0x213   : > { %1765 = vmatpush3.bf16.msra.mxu0 %v665_v42 }
 0x214   : > { %1766 = vmatprep.subr.bf16.mxu0 %v664_v37  ;;  %1832 = vmatpush3.bf16.msra.mxu1 %v1905_v60 }
 0x215   : > { %1825 = vmatprep.subr.bf16.mxu1 %v1906_v63 }
 0x217   : > { %1767 = vmatpush3.bf16.msra.mxu0 %v664_v37 }
 0x218   : > { %1768 = vmatprep.subr.bf16.mxu0 %v663_v36  ;;  %1833 = vmatpush3.bf16.msra.mxu1 %v1906_v63 }
 0x219   : > { %1826 = vmatprep.subr.bf16.mxu1 %v1907_v2 }
 0x21b   : > { %1769 = vmatpush3.bf16.msra.mxu0 %v663_v36 }
 0x21c   : > { %1770 = vmatprep.subr.bf16.mxu0 %v662_v31  ;;  %1834 = vmatpush3.bf16.msra.mxu1 %v1907_v2 }
 0x21d   : > { %1827 = vmatprep.subr.bf16.mxu1 %v1908_v5 }
 0x21f   : > { %1771 = vmatpush3.bf16.msra.mxu0 %v662_v31 }
 0x220   : > { %1772 = vmatprep.subr.bf16.mxu0 %v661_v30  ;;  %1835 = vmatpush3.bf16.msra.mxu1 %v1908_v5 }
 0x221   : > { %1828 = vmatprep.subr.bf16.mxu1 %v1909_v7 }
 0x223   : > { %1773 = vmatpush3.bf16.msra.mxu0 %v661_v30 }
 0x224   : > { %1790 = vmatprep.subr.bf16.mxu0 %v1903_v24  ;;  %1836 = vmatpush3.bf16.msra.mxu1 %v1909_v7 }
 0x225   : > { %1829 = vmatprep.subr.bf16.mxu1 %v1910_v8 }
 0x226   : > { %1775 = vmatmul.mubr.bf16.vlgmr.msra.gmra.mxu0 %v2222_v9 }
 0x227   : > { %1778 = vmatprep.mubr.bf16.mxu0 %v2227_v10  ;;  %1791 = vmatpush3.bf16.msra.mxu0 %v1903_v24 }
 0x228   : > { %1792 = vmatprep.subr.bf16.mxu0 %v1904_v57  ;;  %1837 = vmatpush3.bf16.msra.mxu1 %v1910_v8 }
 0x22b   : > { %1793 = vmatpush3.bf16.msra.mxu0 %v1904_v57 }
 0x22c   : > { %1794 = vmatprep.subr.bf16.mxu0 %v1905_v60 }
 0x22e   : > { %1779 = vmatmul.mubr.bf16.gmra.mxu0 %v2240_v13 }
 0x22f   : > { %1782 = vmatprep.mubr.bf16.mxu0 %v2245_v14  ;;  %1795 = vmatpush3.bf16.msra.mxu0 %v1905_v60 }
 0x230   : > { %1796 = vmatprep.subr.bf16.mxu0 %v1906_v63 }
 0x233   : > { %1797 = vmatpush3.bf16.msra.mxu0 %v1906_v63 }
 0x234   : > { %1798 = vmatprep.subr.bf16.mxu0 %v1907_v2 }
 0x236   : > { %1783 = vmatmul.mubr.bf16.gmra.mxu0 %v2258_v17 }
 0x237   : > { %1786 = vmatprep.mubr.bf16.mxu0 %v2263_v18  ;;  %1799 = vmatpush3.bf16.msra.mxu0 %v1907_v2 }
 0x238   : > { %1800 = vmatprep.subr.bf16.mxu0 %v1908_v5 }
 0x23b   : > { %1801 = vmatpush3.bf16.msra.mxu0 %v1908_v5 }
 0x23c   : > { %1802 = vmatprep.subr.bf16.mxu0 %v1909_v7 }
 0x23e   : > { %1787 = vmatmul.mubr.bf16.gmra.mxu0 %v2276_v21 }
 0x23f   : > { %1803 = vmatpush3.bf16.msra.mxu0 %v1909_v7 }
 0x240   : > { %1804 = vmatprep.subr.bf16.mxu0 %v1910_v8 }
 0x243   : > { %1805 = vmatpush3.bf16.msra.mxu0 %v1910_v8 }
 0x2b1   : > { %v2324_v9 = vpop.f32.mrf.mxu0 }
 0x2b3   : > { %v2326_v10 = vpop.f32.mrf.mxu0 }
 0x2b5   : > { %v2328_v11 = vpop.f32.mrf.mxu0 }
 0x2b7   : > { %v2330_v12 = vpop.f32.mrf.mxu0 }
 0x2b9   : > { %v2332_v13 = vpop.f32.mrf.mxu0 }
 0x2bb   : > { %v2334_v14 = vpop.f32.mrf.mxu0 }
 0x2bd   : > { %v2336_v15 = vpop.f32.mrf.mxu0 }
 0x2bf   : > { %v2338_v16 = vpop.f32.mrf.mxu0 }
 0x2c1   : > { %v2340_v17 = vpop.f32.mrf.mxu0 }
 0x2c3   : > { %v2342_v18 = vpop.f32.mrf.mxu0 }
 0x2c5   : > { %v2344_v19 = vpop.f32.mrf.mxu0 }
 0x2c7   : > { %v2346_v20 = vpop.f32.mrf.mxu0 }
 0x2c9   : > { %v2348_v21 = vpop.f32.mrf.mxu0 }
 0x2cb   : > { %v2350_v22 = vpop.f32.mrf.mxu0 }
 0x2cd   : > { %v2352_v23 = vpop.f32.mrf.mxu0 }
 0x2cf   : > { %v2354_v25 = vpop.f32.mrf.mxu0 }
 0x2e6   : > { %v1776_v26 = vpop.f32.mrf.mxu0 }
 0x2e7   : > { %v1075_v31 = vmul.f32 2.0, %v1776_v26 }
 0x2e8   : > { %v1010_v27 = vpop.f32.mrf.mxu0 }
 0x2e9   : > { %v1073_v29 = vmul.f32 2.0, %v1010_v27  ;;  %v1091_v38 = vsub.f32 %v1075_v31, %v2201_v1 }
 0x2ea   : > { %v1777_v28 = vpop.f32.mrf.mxu0 }
 0x2eb   : > { %v1076_v30 = vmul.f32 2.0, %v1777_v28  ;;  %v1089_v36 = vsub.f32 %v1073_v29, %v2207_v4 }
 0x2ec   : > { %v1013_v32 = vpop.f32.mrf.mxu0 }
 0x2ed   : > { %v1074_v33 = vmul.f32 2.0, %v1013_v32  ;;  %v1092_v34 = vsub.f32 %v1076_v30, %v2205_v3 }
 0x2ee   : > { %v1780_v35 = vpop.f32.mrf.mxu0 }
 0x2ef   : > { %v1090_v37 = vsub.f32 %v1074_v33, %v2212_v6  ;;  %v1106_v41 = vpack.c.bf16 %v1092_v34, %v1091_v38  ;;  %v1079_v45 = vmul.f32 2.0, %v1780_v35 }
 0x2f0   : > { %v1026_v39 = vpop.f32.mrf.mxu0 }
 0x2f1   : > { %v1105_v40 = vpack.c.bf16 %v1090_v37, %v1089_v36  ;;  %v1077_v43 = vmul.f32 2.0, %v1026_v39  ;;  %v1095_v60 = vsub.f32 %v1079_v45, %v2184_v59 }
 0x2f2   : > { %v1781_v42 = vpop.f32.mrf.mxu0 }
 0x2f3   : > { %v1080_v44 = vmul.f32 2.0, %v1781_v42  ;;  %1806 = vmatprep.mubr.bf16.mxu0 %v1105_v40  ;;  %v1093_v24 = vsub.f32 %v1077_v43, %v2194_v62 }
 0x2f4   : > { %v1029_v46 = vpop.f32.mrf.mxu0  ;;  %1807 = vmatmul.mubr.bf16.vlgmr.msra.gmra.mxu0 %v1106_v41 }
 0x2f5   : > { %v1078_v47 = vmul.f32 2.0, %v1029_v46  ;;  %v1096_v52 = vsub.f32 %v1080_v44, %v2191_v61 }
 0x2f6   : > { %v1784_v54 = vpop.f32.mrf.mxu0 }
 0x2f7   : > { %v1094_v57 = vsub.f32 %v1078_v47, %v2199_v0  ;;  %v1108_v5 = vpack.c.bf16 %v1096_v52, %v1095_v60  ;;  %v1083_v27 = vmul.f32 2.0, %v1784_v54 }
 0x2f8   : > { %v1042_v63 = vpop.f32.mrf.mxu0 }
 0x2f9   : > { %v1107_v2 = vpack.c.bf16 %v1094_v57, %v1093_v24  ;;  %v1081_v8 = vmul.f32 2.0, %v1042_v63  ;;  %v1099_v34 = vsub.f32 %v1083_v27, %v2163_v53  ;;  %v1744_v24 = vpop.f32.mrf.mxu1 }
 0x2fa   : > { %v1785_v7 = vpop.f32.mrf.mxu0 }
 0x2fb   : > { %v1084_v26 = vmul.f32 2.0, %v1785_v7  ;;  %1810 = vmatprep.mubr.bf16.mxu1 %v1107_v2  ;;  %v1097_v32 = vsub.f32 %v1081_v8, %v2174_v56  ;;  %v913_v57 = vpop.f32.mrf.mxu1 }
 0x2fc   : > { %v1045_v28 = vpop.f32.mrf.mxu0  ;;  %1811 = vmatmul.mubr.bf16.vlgmr.msra.gmra.mxu1 %v1108_v5 }
 0x2fd   : > { %v1082_v29 = vmul.f32 2.0, %v1045_v28  ;;  %v1100_v30 = vsub.f32 %v1084_v26, %v2171_v55  ;;  %v1745_v60 = vpop.f32.mrf.mxu1 }
 0x2fe   : > { %v1788_v31 = vpop.f32.mrf.mxu0 }
 0x2ff   : > { %v1098_v33 = vsub.f32 %v1082_v29, %v2181_v58  ;;  %v1110_v38 = vpack.c.bf16 %v1100_v30, %v1099_v34  ;;  %v1087_v41 = vmul.f32 2.0, %v1788_v31  ;;  %v916_v63 = vpop.f32.mrf.mxu1  ;;  %v2383_v34 = vld [vmem:[%s2517_s5] ss:$0 sm:$0xff] }
 0x300   : > { %v1058_v35 = vpop.f32.mrf.mxu0 }
 0x301   : > { %v1109_v36 = vpack.c.bf16 %v1098_v33, %v1097_v32  ;;  %v1085_v39 = vmul.f32 2.0, %v1058_v35  ;;  %v1103_v47 = vsub.f32 %v1087_v41, %v2155_v50  ;;  %v1748_v2 = vpop.f32.mrf.mxu1  ;;  %v922_v32 = vadd.f32 %v1744_v24, %v2324_v9 }
 0x302   : > { %v1789_v37 = vpop.f32.mrf.mxu0  ;;  %v914_v35 = vadd.f32 %v913_v57, %v2326_v10 }
 0x303   : > { %v1088_v40 = vmul.f32 2.0, %v1789_v37  ;;  %1814 = vmatprep.mubr.bf16.mxu1 %v1109_v36  ;;  %v1101_v45 = vsub.f32 %v1085_v39, %v2151_v48  ;;  %v929_v5 = vpop.f32.mrf.mxu1  ;;  %v925_v39 = vadd.f32 %v1745_v60, %v2328_v11 }
 0x304   : > { %v1061_v42 = vpop.f32.mrf.mxu0  ;;  %1815 = vmatmul.mubr.bf16.gmra.mxu1 %v1110_v38 }
 0x305   : > { %v1086_v43 = vmul.f32 2.0, %v1061_v42  ;;  %v1104_v44 = vsub.f32 %v1088_v40, %v2153_v49  ;;  %v1749_v7 = vpop.f32.mrf.mxu1  ;;  %v917_v42 = vadd.f32 %v916_v63, %v2330_v12 }
 0x306   : > { %v941_v63 = vadd.f32 %v1749_v7, %v2336_v15 }
 0x307   : > { %v1102_v46 = vsub.f32 %v1086_v43, %v2157_v51  ;;  %v1112_v54 = vpack.c.bf16 %v1104_v44, %v1103_v47  ;;  %v932_v8 = vpop.f32.mrf.mxu1  ;;  %v938_v47 = vadd.f32 %v1748_v2, %v2332_v13 }
 0x309   : > { %v1111_v52 = vpack.c.bf16 %v1102_v46, %v1101_v45  ;;  %v1752_v26 = vpop.f32.mrf.mxu1 }
 0x30a   : > { %v954_v15 = vadd.f32 %v1752_v26, %v2340_v17 }
 0x30b   : > { %1818 = vmatprep.mubr.bf16.mxu1 %v1111_v52  ;;  %v945_v27 = vpop.f32.mrf.mxu1 }
 0x30c   : > { %1819 = vmatmul.mubr.bf16.gmra.mxu1 %v1112_v54  ;;  %v930_v54 = vadd.f32 %v929_v5, %v2334_v14  ;;  %v933_v14 = vadd.f32 %v932_v8, %v2338_v16  ;;  %v946_v16 = vadd.f32 %v945_v27, %v2342_v18 }
 0x30d   : > { %v1753_v28 = vpop.f32.mrf.mxu1 }
 0x30e   : > { %v957_v17 = vadd.f32 %v1753_v28, %v2344_v19 }
 0x30f   : > { %v2372_v29 = vpop.f32.mrf.mxu1 }
 0x310   : > { %v949_v18 = vadd.f32 %v2372_v29, %v2346_v20 }
 0x311   : > { %v2374_v30 = vpop.f32.mrf.mxu1 }
 0x312   : > { %v970_v19 = vadd.f32 %v2374_v30, %v2348_v21 }
 0x313   : > { %v2376_v31 = vpop.f32.mrf.mxu1 }
 0x314   : > { %v962_v20 = vadd.f32 %v2376_v31, %v2350_v22 }
 0x315   : > { %v2388_v37 = vpop.f32.mrf.mxu1 }
 0x316   : > { %v973_v21 = vadd.f32 %v2388_v37, %v2352_v23 }
 0x317   : > { %v2395_v10 = vpop.f32.mrf.mxu1 }
 0x3b4   : > { %v1808_v33 = vpop.f32.mrf.mxu0 }
 0x3b5   : > { %v1277_v36 = vadd.f32 %v1808_v33, %v922_v32 }
 0x3b6   : > { %v1212_v38 = vpop.f32.mrf.mxu0 }
 0x3b7   : > { %v1300_v40 = vadd.f32 %v2383_v34, %v1277_v36  ;;  %v1275_v41 = vadd.f32 %v1212_v38, %v914_v35 }
 0x3b8   : > { %v1809_v9 = vpop.f32.mrf.mxu0 }
 0x3b9   : > { %v1316_v43 = vadd.f32 %v1300_v40, %v2201_v1  ;;  %v1298_v44 = vadd.f32 %v2383_v34, %v1275_v41  ;;  %v1278_v45 = vadd.f32 %v1809_v9, %v925_v39 }
 0x3ba   : > { %v1215_v46 = vpop.f32.mrf.mxu0 }
 0x3bb   : > { %1332 = vst [vmem:[%s2398_s10 + $0x10] sm:$0xff] %v1316_v43  ;;  %v1314_v11 = vadd.f32 %v1298_v44, %v2207_v4  ;;  %v1301_v12 = vadd.f32 %v2383_v34, %v1278_v45  ;;  %v1276_v1 = vadd.f32 %v1215_v46, %v917_v42 }
 0x3bc   : > { %v1812_v52 = vpop.f32.mrf.mxu1 }
 0x3bd   : > { %1330 = vst [vmem:[%s2398_s10] sm:$0xff] %v1314_v11  ;;  %v1317_v24 = vadd.f32 %v1301_v12, %v2205_v3  ;;  %v1299_v13 = vadd.f32 %v2383_v34, %v1276_v1  ;;  %v1281_v57 = vadd.f32 %v1812_v52, %v938_v47 }
 0x3be   : > { %v1228_v60 = vpop.f32.mrf.mxu1 }
 0x3bf   : > { %1333 = vst [vmem:[%s2398_s10 + $0x18] sm:$0xff] %v1317_v24  ;;  %v1315_v4 = vadd.f32 %v1299_v13, %v2212_v6  ;;  %v1304_v2 = vadd.f32 %v2383_v34, %v1281_v57  ;;  %v1279_v32 = vadd.f32 %v1228_v60, %v930_v54 }
 0x3c0   : > { %v1813_v33 = vpop.f32.mrf.mxu1 }
 0x3c1   : > { %1331 = vst [vmem:[%s2398_s10 + $0x8] sm:$0xff] %v1315_v4  ;;  %v1320_v3 = vadd.f32 %v1304_v2, %v2184_v59  ;;  %v1302_v5 = vadd.f32 %v2383_v34, %v1279_v32  ;;  %v1282_v35 = vadd.f32 %v1813_v33, %v941_v63 }
 0x3c2   : > { %v1231_v36 = vpop.f32.mrf.mxu1 }
 0x3c3   : > { %1336 = vst [vmem:[%s2398_s10 + $0x30] sm:$0xff] %v1320_v3  ;;  %v1318_v6 = vadd.f32 %v1302_v5, %v2194_v62  ;;  %v1305_v7 = vadd.f32 %v2383_v34, %v1282_v35  ;;  %v1280_v38 = vadd.f32 %v1231_v36, %v933_v14 }
 0x3c4   : > { %v1816_v39 = vpop.f32.mrf.mxu1 }
 0x3c5   : > { %1334 = vst [vmem:[%s2398_s10 + $0x20] sm:$0xff] %v1318_v6  ;;  %v1321_v59 = vadd.f32 %v1305_v7, %v2191_v61  ;;  %v1303_v8 = vadd.f32 %v2383_v34, %v1280_v38  ;;  %v1285_v40 = vadd.f32 %v1816_v39, %v954_v15 }
 0x3c6   : > { %v1244_v41 = vpop.f32.mrf.mxu1 }
 0x3c7   : > { %1337 = vst [vmem:[%s2398_s10 + $0x38] sm:$0xff] %v1321_v59  ;;  %v1319_v62 = vadd.f32 %v1303_v8, %v2199_v0  ;;  %v1308_v26 = vadd.f32 %v2383_v34, %v1285_v40  ;;  %v1283_v9 = vadd.f32 %v1244_v41, %v946_v16 }
 0x3c8   : > { %v1817_v42 = vpop.f32.mrf.mxu1 }
 0x3c9   : > { %1335 = vst [vmem:[%s2398_s10 + $0x28] sm:$0xff] %v1319_v62  ;;  %v1324_v61 = vadd.f32 %v1308_v26, %v2163_v53  ;;  %v1306_v27 = vadd.f32 %v2383_v34, %v1283_v9  ;;  %v1286_v43 = vadd.f32 %v1817_v42, %v957_v17 }
 0x3ca   : > { %v1247_v44 = vpop.f32.mrf.mxu1 }
 0x3cb   : > { %1340 = vst [vmem:[%s2398_s10 + $0x50] sm:$0xff] %v1324_v61  ;;  %v1322_v0 = vadd.f32 %v1306_v27, %v2174_v56  ;;  %v1309_v28 = vadd.f32 %v2383_v34, %v1286_v43  ;;  %v1284_v45 = vadd.f32 %v1247_v44, %v949_v18 }
 0x3cc   : > { %v1820_v46 = vpop.f32.mrf.mxu1 }
 0x3cd   : > { %1338 = vst [vmem:[%s2398_s10 + $0x40] sm:$0xff] %v1322_v0  ;;  %v1325_v53 = vadd.f32 %v1309_v28, %v2171_v55  ;;  %v1307_v29 = vadd.f32 %v2383_v34, %v1284_v45  ;;  %v1289_v47 = vadd.f32 %v1820_v46, %v970_v19  ;;  %v965_v55 = vadd.f32 %v2395_v10, %v2354_v25 }
 0x3ce   : > { %v1260_v11 = vpop.f32.mrf.mxu1 }
 0x3cf   : > { %1341 = vst [vmem:[%s2398_s10 + $0x58] sm:$0xff] %v1325_v53  ;;  %v1323_v56 = vadd.f32 %v1307_v29, %v2181_v58  ;;  %v1312_v30 = vadd.f32 %v2383_v34, %v1289_v47  ;;  %v1287_v22 = vadd.f32 %v1260_v11, %v962_v20 }
 0x3d0   : > { %v1821_v31 = vpop.f32.mrf.mxu1 }
 0x3d1   : > { %1339 = vst [vmem:[%s2398_s10 + $0x48] sm:$0xff] %v1323_v56  ;;  %v1328_v12 = vadd.f32 %v1312_v30, %v2155_v50  ;;  %v1310_v1 = vadd.f32 %v2383_v34, %v1287_v22  ;;  %v1290_v23 = vadd.f32 %v1821_v31, %v973_v21 }
 0x3d2   : > { %v1263_v37 = vpop.f32.mrf.mxu1 }
 0x3d3   : > { %1344 = vst [vmem:[%s2398_s10 + $0x70] sm:$0xff] %v1328_v12  ;;  %v1326_v58 = vadd.f32 %v1310_v1, %v2151_v48  ;;  %v1313_v52 = vadd.f32 %v2383_v34, %v1290_v23  ;;  %v1288_v54 = vadd.f32 %v1263_v37, %v965_v55 }
 0x3d5   : > { %1342 = vst [vmem:[%s2398_s10 + $0x60] sm:$0xff] %v1326_v58  ;;  %v1329_v25 = vadd.f32 %v1313_v52, %v2153_v49  ;;  %v1311_v50 = vadd.f32 %v2383_v34, %v1288_v54 }
 0x3d7   : > { %1345 = vst [vmem:[%s2398_s10 + $0x78] sm:$0xff] %v1329_v25  ;;  %v1327_v48 = vadd.f32 %v1311_v50, %v2157_v51 }
 0x3d9   : > { %1343 = vst [vmem:[%s2398_s10 + $0x68] sm:$0xff] %v1327_v48 }
 0x3da   : > { %1924 = shalt.err (!%p1921_p3)
}
 0x3db   : > { %s1925_s20 = scalar_lea.hbm %s2463_s15, 2048  ;;  %s1929_s29 = scalar_lea.hbm %s2518_s6, 4096 }
 0x3dc   : > { %p1926_p4 = scmp.ne.s32.totalorder %s2463_s15, %s1925_s20  ;;  %p1930_p9 = scmp.lt.s32.totalorder %s2463_s15, %s2518_s6 }
 0x3dd   : > { %p1931_p10 = scmp.lt.s32.totalorder %s1929_s29, %s1925_s20 }
 0x3de   : > { %p1927_p7 = pnand %p1926_p4, %p2049_p5 }
 0x3df   : > { %p1932_p11 = por %p1931_p10, %p1930_p9 }
 0x3e0   : > { %p1928_p8 = pneg %p1927_p7 }
 0x3e2   : > { %p1933_p12 = pnand %p1932_p11, %p1928_p8 }
 0x3e4   : > { %1936 = shalt.err (!%p1933_p12)
}
 0x3e5   : > { %s1974_s11 = smov 128   ;;  %s1975_s13 = smov 8  }
 0x3e6   : > { %1838 = dma.vmem_to_hbm [thread:$0]  (%p2049_p5), %s2465_s12, 2048, %s2463_s15, %s2472_s25, %s1974_s11, %s1974_s11, %s1975_s13  }
 0x3e7 PF: > { %p1844_p13 = scmp.ge.s32.totalorder %s1971_s24, 2  ;;  %s1375_s14 = sand.u32 1, %s1959_s21  }
 0x3e8   : > { %s1376_s16 = scalar_lea.sflag [#allocation3], %s1375_s14 }
 0x3e9   : > { %p1841_p0 = pnand %p1844_p13, %p2053_p6 }
 0x3eb   : > { %p1842_p1 = pneg %p1841_p0 }
 0x3ed   : > { %1954 = dma.done.wait (%p1842_p1), %s1376_s16, 2048  }
 0x3ee   : > { %1956 = vsyncadd (%p1842_p1), %s1376_s16, 4294965248  ;;  %p16_p2 = scmp.ge.s32.totalorder %s2036_s27, 4   ;;  %s2521_s21 = smov %s1963_s22 }
 0x3ef   : > { %s2522_s22 = smov %s1967_s23  ;;  %s2523_s23 = smov %s2047_s30 }
 0x3f0   : > { %s2524_s24 = smov %s2036_s27  ;;  %18 = sbr.rel (!%p16_p2) target bundleno = 3 (0x3), region = 81 }
 0x3f5   :  { %1381 = vsyncpa [#allocation3], 1 }
 0x3f6   :  { %1383 = vsyncpa [#allocation3 + $0x1], 1 }

</bundles_post_ra>
